<compile_context>
chip_gen: v6e
topology: v6e:2x2x1
jax: 0.10.0
libtpu: 0.0.40
codegen_flags: <defaults>
</compile_context>

<pallas_src>
import functools
import math

import jax
import jax.numpy as jnp
from jax.experimental import pallas as pl
from jax.experimental.pallas import tpu as pltpu

_LANES = 128
_SUBLANES = 8


def _bdice_kernel(out_ref, tgt_ref, res_ref, acc_ref, *, s_valid, n_sp, n_blk_cov):
    """Per-(batch, spatial-split) partial reductions for the BDice loss.

    out_ref: (1, C, TILE_R, 128) producer dtype
    tgt_ref: (1, 1, TILE_R, 128) int32 labels
    res_ref: (1, 1, 3, C) f32  -- [intersection, sum(out^2), sum(one-hot)]
    acc_ref: (3, C, 8, 128) f32 VMEM scratch (sublane/lane-preserving accumulator)
    """
    C = out_ref.shape[1]
    tile_r = out_ref.shape[2]
    r8 = tile_r // _SUBLANES

    p = pl.program_id(1)
    s = pl.program_id(2)

    @pl.when(s == 0)
    def _():
        acc_ref[...] = jnp.zeros_like(acc_ref)

    x = out_ref[0].astype(jnp.float32)            # (C, TILE_R, 128), f32 accumulate
    t = jnp.clip(tgt_ref[0, 0], 0, 2)             # (TILE_R, 128) -- spec: clamp(target, 0, 2)

    def accumulate(t_eff, valid):
        # t_eff: (TILE_R, 128) int32 (invalid positions already set to sentinel C)
        # valid: None (fully-valid block) or (r8, 8, 128) bool
        for c in range(C):                        # static per-class loop (no 3-D iota)
            xc = x[c].reshape(r8, _SUBLANES, _LANES)
            mc = (t_eff == c).reshape(r8, _SUBLANES, _LANES)
            sq = xc * xc
            if valid is not None:
                # only the x^2 term needs the mask; mc already excludes invalid
                # positions for the intersection / count terms (t_eff == C there).
                sq = jnp.where(valid, sq, 0.0)
            acc_ref[0, c] += jnp.sum(jnp.where(mc, xc, 0.0), axis=0)    # intersection
            acc_ref[1, c] += jnp.sum(sq, axis=0)                        # sum(output^2)
            acc_ref[2, c] += jnp.sum(mc.astype(jnp.float32), axis=0)    # sum(one-hot)

    # Blocks with global spatial index < n_full are statically fully inside the
    # true extent -> unmasked fast path.  Only tail / over-run blocks pay for
    # the validity mask; fully aligned inputs get no mask codegen at all.
    n_full = s_valid // (tile_r * _LANES)
    if n_full >= n_blk_cov:
        accumulate(t, None)
    else:
        g = p * n_sp + s                          # global spatial block index

        @pl.when(g < n_full)
        def _():
            accumulate(t, None)

        @pl.when(g >= n_full)
        def _():
            last_row = s_valid // _LANES          # static python ints
            tail_lanes = s_valid % _LANES
            row = g * tile_r + jax.lax.broadcasted_iota(jnp.int32, (tile_r, _LANES), 0)
            lane = jax.lax.broadcasted_iota(jnp.int32, (tile_r, _LANES), 1)
            valid = (row < last_row) | ((row == last_row) & (lane < tail_lanes))
            # Fold validity into the target: class id C never matches any class.
            accumulate(jnp.where(valid, t, C),
                       valid.reshape(r8, _SUBLANES, _LANES))

    @pl.when(s == n_sp - 1)
    def _():
        # One XLU collapse per (batch, split): 8 sublanes then 128 lanes -> (3, C).
        res_ref[0, 0] = acc_ref[...].sum(axis=2).sum(axis=-1)


def normal_bdice_loss(output, target):
    """output: (N, C, *spatial) float; target: (N, 1, *spatial) integer labels."""
    N, C = output.shape[:2]
    S = int(math.prod(output.shape[2:]))

    # ---- spatial layout: (N, C, S) -> (N, C, R_arr, 128), lane-dense ----
    R = pl.cdiv(S, _LANES)                 # 128-lane rows covering the true extent
    R_arr = max(R, _SUBLANES)              # array rows; tiny inputs rounded up to 8 rows
    S_arr = R_arr * _LANES

    out_flat = output.reshape(N, C, S)     # keep producer dtype (no upcast pass)
    tgt_flat = target.reshape(N, 1, S)
    if tgt_flat.dtype != jnp.int32:
        # TODO(synk): accept int8 labels end-to-end (saves ~25% HBM traffic on
        # v5e/v6e) once the producer hands over narrow labels.
        tgt_flat = tgt_flat.astype(jnp.int32)
    if S_arr != S:
        # Only pad to the next 128 multiple (>= 8 rows); tile-granularity padding
        # is handled by block over-run + the in-kernel mask, not a full-tensor pad.
        out_flat = jnp.pad(out_flat, ((0, 0), (0, 0), (0, S_arr - S)))
        tgt_flat = jnp.pad(tgt_flat, ((0, 0), (0, 0), (0, S_arr - S)))
    out_4d = out_flat.reshape(N, C, R_arr, _LANES)
    tgt_4d = tgt_flat.reshape(N, 1, R_arr, _LANES)

    # ---- tile sizing: ~6-8 MiB of input per grid step (double-buffered by Pallas,
    #      plus the in-kernel f32 temporaries) ----
    out_bytes = jnp.dtype(output.dtype).itemsize
    tgt_bytes = jnp.dtype(tgt_flat.dtype).itemsize
    bytes_per_row = (C * out_bytes + tgt_bytes) * _LANES
    try:
        vmem_cap = int(pltpu.get_tpu_info().vmem_capacity_bytes)
    except Exception:
        vmem_cap = 64 * 1024 * 1024
    # 8 MiB steps on 128 MiB-VMEM parts (v5e/v6e), 6 MiB on 64 MiB parts (v7x).
    step_budget = 8 * 1024 * 1024 if vmem_cap >= (96 << 20) else 6 * 1024 * 1024
    vmem_limit = min(int(0.75 * vmem_cap), 64 * 1024 * 1024)

    tile_r = min(step_budget // bytes_per_row, R_arr)
    tile_r = max(_SUBLANES, (tile_r // _SUBLANES) * _SUBLANES)
    if tile_r >= 32:
        tile_r = (tile_r // 32) * 32       # friendly to sub-32-bit packed layouts
    n_blk = pl.cdiv(R_arr, tile_r)

    # ---- v7x megacore: guarantee >= 2 parallel grid units when the batch is 1 ----
    P = 2 if (N < 2 and n_blk >= 2) else 1
    n_sp = pl.cdiv(n_blk, P)
    n_blk_cov = P * n_sp

    if n_blk_cov > n_blk:
        # Odd split: clamp so no block index points fully past the array; the
        # duplicated block is fully masked in-kernel (its unclamped g >= n_full).
        def spatial_map(n, p, s):
            return (n, 0, jnp.minimum(p * n_sp + s, n_blk - 1), 0)
    else:
        def spatial_map(n, p, s):
            return (n, 0, p * n_sp + s, 0)

    kernel = functools.partial(_bdice_kernel, s_valid=S, n_sp=n_sp, n_blk_cov=n_blk_cov)

    cost = pl.CostEstimate(
        flops=6 * N * C * S,
        transcendentals=0,
        bytes_accessed=N * C * S * out_bytes + N * S * tgt_bytes + N * P * 3 * C * 4,
    )

    res = pl.pallas_call(
        kernel,
        out_shape=jax.ShapeDtypeStruct((N, P, 3, C), jnp.float32),
        grid_spec=pltpu.PrefetchScalarGridSpec(
            num_scalar_prefetch=0,
            grid=(N, P, n_sp),                               # spatial reduction axis last
            in_specs=[
                pl.BlockSpec((1, C, tile_r, _LANES), spatial_map),
                pl.BlockSpec((1, 1, tile_r, _LANES), spatial_map),
            ],
            out_specs=pl.BlockSpec((1, 1, 3, C), lambda n, p, s: (n, p, 0, 0)),
            scratch_shapes=[pltpu.VMEM((3, C, _SUBLANES, _LANES), jnp.float32)],
        ),
        compiler_params=pltpu.CompilerParams(
            dimension_semantics=("parallel", "parallel", "arbitrary"),
            vmem_limit_bytes=vmem_limit,
        ),
        cost_estimate=cost,
    )(out_4d, tgt_4d)

    # ---- combine spatial-split partials + tiny (N, C) weighting / mean glue ----
    res = res.sum(axis=1)                  # (N, 3, C)
    inter = res[:, 0, :]                   # (N, C)
    osq = res[:, 1, :]                     # (N, C)
    tsum = res[:, 2, :]                    # (N, C)  one-hot, so sum == sum of squares

    class_t = C - 1
    w_b = jnp.ones((N, C), jnp.float32) / N
    partial_volume = tsum[:, class_t] ** 0.3333
    total_volume = jnp.sum(partial_volume)
    w_b = w_b.at[:, class_t].set(partial_volume / (total_volume + 1e-10))

    union = osq + tsum
    score = jnp.mean(2.0 * w_b * inter / (union + 1e-10))
    return 1.0 - score


def _reference(output, target):
    # Pure-JAX transcription of the PyTorch forward, for a correctness check.
    N, C = output.shape[:2]
    class_t = C - 1
    t = jnp.clip(target, 0, 2)[:, 0]                            # (N, H, W)
    onehot = jax.nn.one_hot(t, C, axis=1, dtype=jnp.float32)    # (N, C, H, W)
    out = output.astype(jnp.float32)
    red = tuple(range(2, output.ndim))
    w_b = jnp.ones((N, C), jnp.float32) / N
    pv = onehot.sum(red)[:, class_t] ** 0.3333
    tv = pv.sum()
    w_b = w_b.at[:, class_t].set(pv / (tv + 1e-10))
    inter = (out * onehot).sum(red)
    union = (out ** 2).sum(red) + (onehot ** 2).sum(red)
    score = (2.0 * w_b * inter / (union + 1e-10)).mean()
    return 1.0 - score


if __name__ == "__main__":
    key = jax.random.PRNGKey(0)
    k1, k2 = jax.random.split(key)
    # output (N, C, H, W) float probs ; target (N, 1, H, W) integer labels
    output = jax.random.uniform(k1, (2, 4, 16, 16), jnp.float32)
    target = jax.random.randint(k2, (2, 1, 16, 16), 0, 4, jnp.int32)

    loss = jax.jit(normal_bdice_loss)(output, target)
    loss = jax.block_until_ready(loss)

    ref = _reference(output, target)
    assert jnp.allclose(loss, ref, atol=1e-5, rtol=1e-5), (loss, ref)
    print("KERNEL_OK")
</pallas_src>

<mosaic_0001>
module attributes {stable_mosaic.version = 11 : i64} {
  func.func @_bdice_kernel(%arg0: i32, %arg1: i32, %arg2: i32, %arg3: memref<1x4x8x128xf32, #tpu.memory_space<vmem>>, %arg4: memref<1x1x8x128xi32, #tpu.memory_space<vmem>>, %arg5: memref<1x1x3x4xf32, #tpu.memory_space<vmem>>, %arg6: memref<3x4x8x128xf32, #tpu.memory_space<vmem>>) attributes {dimension_semantics = [#tpu.dimension_semantics<parallel>, #tpu.dimension_semantics<parallel>, #tpu.dimension_semantics<arbitrary>], iteration_bounds = array<i64: 2, 1, 1>, scalar_prefetch = 0 : i64, scratch_operands = 1 : i64, tpu.core_type = #tpu.core_type<tc>, window_params = [{transform_indices = @transform_0, window_bounds = array<i64: 1, 4, 8, 128>}, {transform_indices = @transform_1, window_bounds = array<i64: 1, 1, 8, 128>}, {transform_indices = @transform_2, window_bounds = array<i64: 1, 1, 3, 4>}]} {
    %c0_i32 = arith.constant 0 : i32
    %0 = arith.cmpi eq, %arg2, %c0_i32 : i32
    %1 = arith.extui %0 : i1 to i32
    %c0_i32_0 = arith.constant 0 : i32
    %2 = arith.cmpi ne, %1, %c0_i32_0 : i32
    scf.if %2 {
      %cst = arith.constant 0.000000e+00 : f32
      %22 = vector.broadcast %cst : f32 to vector<3x4x8x128xf32>
      %c0_15 = arith.constant 0 : index
      %c0_16 = arith.constant 0 : index
      %c0_17 = arith.constant 0 : index
      %c0_18 = arith.constant 0 : index
      %23 = vector.load %arg6[%c0_15, %c0_16, %c0_17, %c0_18] : memref<3x4x8x128xf32, #tpu.memory_space<vmem>>, vector<3x4x8x128xf32>
      tpu.vector_store %arg6[%c0_15, %c0_16, %c0_17, %c0_18], %22 {strides = array<i32>} : memref<3x4x8x128xf32, #tpu.memory_space<vmem>>, vector<3x4x8x128xf32>,
    } else {
    }
    %c0 = arith.constant 0 : index
    %c0_1 = arith.constant 0 : index
    %c0_2 = arith.constant 0 : index
    %c0_3 = arith.constant 0 : index
    %3 = vector.load %arg3[%c0, %c0_1, %c0_2, %c0_3] : memref<1x4x8x128xf32, #tpu.memory_space<vmem>>, vector<1x4x8x128xf32>
    %4 = vector.shape_cast %3 : vector<1x4x8x128xf32> to vector<4x8x128xf32>
    %c0_4 = arith.constant 0 : index
    %c0_5 = arith.constant 0 : index
    %c0_6 = arith.constant 0 : index
    %c0_7 = arith.constant 0 : index
    %5 = vector.load %arg4[%c0_4, %c0_5, %c0_6, %c0_7] : memref<1x1x8x128xi32, #tpu.memory_space<vmem>>, vector<1x1x8x128xi32>
    %6 = vector.shape_cast %5 : vector<1x1x8x128xi32> to vector<8x128xi32>
    %c0_i32_8 = arith.constant 0 : i32
    %c2_i32 = arith.constant 2 : i32
    %7 = vector.broadcast %c0_i32_8 : i32 to vector<8x128xi32>
    %8 = arith.maxsi %7, %6 : vector<8x128xi32>
    %9 = vector.broadcast %c2_i32 : i32 to vector<8x128xi32>
    %10 = arith.minsi %9, %8 : vector<8x128xi32>
    %c1_i32 = arith.constant 1 : i32
    %11 = arith.muli %arg1, %c1_i32 : i32
    %12 = arith.addi %11, %arg2 : i32
    %c0_i32_9 = arith.constant 0 : i32
    %13 = arith.cmpi slt, %12, %c0_i32_9 : i32
    %14 = arith.extui %13 : i1 to i32
    %c0_i32_10 = arith.constant 0 : i32
    %15 = arith.cmpi ne, %14, %c0_i32_10 : i32
    scf.if %15 {
      %22 = vector.extract_strided_slice %4 {offsets = [0, 0, 0], sizes = [1, 8, 128], strides = [1, 1, 1]} : vector<4x8x128xf32> to vector<1x8x128xf32>
      %23 = vector.shape_cast %22 : vector<1x8x128xf32> to vector<8x128xf32>
      %24 = vector.shape_cast %23 : vector<8x128xf32> to vector<1x8x128xf32>
      %c0_i32_15 = arith.constant 0 : i32
      %25 = vector.broadcast %c0_i32_15 : i32 to vector<8x128xi32>
      %26 = arith.cmpi eq, %10, %25 : vector<8x128xi32>
      %27 = vector.shape_cast %26 : vector<8x128xi1> to vector<1x8x128xi1>
      %28 = arith.mulf %24, %24 : vector<1x8x128xf32>
      %c0_16 = arith.constant 0 : index
      %c0_17 = arith.constant 0 : index
      %c0_18 = arith.constant 0 : index
      %c0_19 = arith.constant 0 : index
      %29 = vector.load %arg6[%c0_16, %c0_17, %c0_18, %c0_19] : memref<3x4x8x128xf32, #tpu.memory_space<vmem>>, vector<1x1x8x128xf32>
      %30 = vector.shape_cast %29 : vector<1x1x8x128xf32> to vector<8x128xf32>
      %cst = arith.constant 0.000000e+00 : f32
      %31 = vector.broadcast %cst : f32 to vector<1x8x128xf32>
      %32 = arith.select %27, %24, %31 : vector<1x8x128xi1>, vector<1x8x128xf32>
      %cst_20 = arith.constant dense<0.000000e+00> : vector<8x128xf32>
      %33 = vector.multi_reduction <add>, %32, %cst_20 [0] : vector<1x8x128xf32> to vector<8x128xf32>
      %34 = arith.addf %30, %33 : vector<8x128xf32>
      %c0_21 = arith.constant 0 : index
      %c0_22 = arith.constant 0 : index
      %c0_23 = arith.constant 0 : index
      %c0_24 = arith.constant 0 : index
      %35 = vector.load %arg6[%c0_21, %c0_22, %c0_23, %c0_24] : memref<3x4x8x128xf32, #tpu.memory_space<vmem>>, vector<1x1x8x128xf32>
      %36 = vector.shape_cast %35 : vector<1x1x8x128xf32> to vector<8x128xf32>
      %37 = vector.shape_cast %34 : vector<8x128xf32> to vector<1x1x8x128xf32>
      tpu.vector_store %arg6[%c0_21, %c0_22, %c0_23, %c0_24], %37 {strides = array<i32>} : memref<3x4x8x128xf32, #tpu.memory_space<vmem>>, vector<1x1x8x128xf32>,
      %c1 = arith.constant 1 : index
      %c0_25 = arith.constant 0 : index
      %c0_26 = arith.constant 0 : index
      %c0_27 = arith.constant 0 : index
      %38 = vector.load %arg6[%c1, %c0_25, %c0_26, %c0_27] : memref<3x4x8x128xf32, #tpu.memory_space<vmem>>, vector<1x1x8x128xf32>
      %39 = vector.shape_cast %38 : vector<1x1x8x128xf32> to vector<8x128xf32>
      %cst_28 = arith.constant dense<0.000000e+00> : vector<8x128xf32>
      %40 = vector.multi_reduction <add>, %28, %cst_28 [0] : vector<1x8x128xf32> to vector<8x128xf32>
      %41 = arith.addf %39, %40 : vector<8x128xf32>
      %c1_29 = arith.constant 1 : index
      %c0_30 = arith.constant 0 : index
      %c0_31 = arith.constant 0 : index
      %c0_32 = arith.constant 0 : index
      %42 = vector.load %arg6[%c1_29, %c0_30, %c0_31, %c0_32] : memref<3x4x8x128xf32, #tpu.memory_space<vmem>>, vector<1x1x8x128xf32>
      %43 = vector.shape_cast %42 : vector<1x1x8x128xf32> to vector<8x128xf32>
      %44 = vector.shape_cast %41 : vector<8x128xf32> to vector<1x1x8x128xf32>
      tpu.vector_store %arg6[%c1_29, %c0_30, %c0_31, %c0_32], %44 {strides = array<i32>} : memref<3x4x8x128xf32, #tpu.memory_space<vmem>>, vector<1x1x8x128xf32>,
      %c2 = arith.constant 2 : index
      %c0_33 = arith.constant 0 : index
      %c0_34 = arith.constant 0 : index
      %c0_35 = arith.constant 0 : index
      %45 = vector.load %arg6[%c2, %c0_33, %c0_34, %c0_35] : memref<3x4x8x128xf32, #tpu.memory_space<vmem>>, vector<1x1x8x128xf32>
      %46 = vector.shape_cast %45 : vector<1x1x8x128xf32> to vector<8x128xf32>
      %47 = arith.extui %27 : vector<1x8x128xi1> to vector<1x8x128xi32>
      %48 = arith.sitofp %47 : vector<1x8x128xi32> to vector<1x8x128xf32>
      %cst_36 = arith.constant dense<0.000000e+00> : vector<8x128xf32>
      %49 = vector.multi_reduction <add>, %48, %cst_36 [0] : vector<1x8x128xf32> to vector<8x128xf32>
      %50 = arith.addf %46, %49 : vector<8x128xf32>
      %c2_37 = arith.constant 2 : index
      %c0_38 = arith.constant 0 : index
      %c0_39 = arith.constant 0 : index
      %c0_40 = arith.constant 0 : index
      %51 = vector.load %arg6[%c2_37, %c0_38, %c0_39, %c0_40] : memref<3x4x8x128xf32, #tpu.memory_space<vmem>>, vector<1x1x8x128xf32>
      %52 = vector.shape_cast %51 : vector<1x1x8x128xf32> to vector<8x128xf32>
      %53 = vector.shape_cast %50 : vector<8x128xf32> to vector<1x1x8x128xf32>
      tpu.vector_store %arg6[%c2_37, %c0_38, %c0_39, %c0_40], %53 {strides = array<i32>} : memref<3x4x8x128xf32, #tpu.memory_space<vmem>>, vector<1x1x8x128xf32>,
      %54 = vector.extract_strided_slice %4 {offsets = [1, 0, 0], sizes = [1, 8, 128], strides = [1, 1, 1]} : vector<4x8x128xf32> to vector<1x8x128xf32>
      %55 = vector.shape_cast %54 : vector<1x8x128xf32> to vector<8x128xf32>
      %56 = vector.shape_cast %55 : vector<8x128xf32> to vector<1x8x128xf32>
      %c1_i32_41 = arith.constant 1 : i32
      %57 = vector.broadcast %c1_i32_41 : i32 to vector<8x128xi32>
      %58 = arith.cmpi eq, %10, %57 : vector<8x128xi32>
      %59 = vector.shape_cast %58 : vector<8x128xi1> to vector<1x8x128xi1>
      %60 = arith.mulf %56, %56 : vector<1x8x128xf32>
      %c0_42 = arith.constant 0 : index
      %c1_43 = arith.constant 1 : index
      %c0_44 = arith.constant 0 : index
      %c0_45 = arith.constant 0 : index
      %61 = vector.load %arg6[%c0_42, %c1_43, %c0_44, %c0_45] : memref<3x4x8x128xf32, #tpu.memory_space<vmem>>, vector<1x1x8x128xf32>
      %62 = vector.shape_cast %61 : vector<1x1x8x128xf32> to vector<8x128xf32>
      %cst_46 = arith.constant 0.000000e+00 : f32
      %63 = vector.broadcast %cst_46 : f32 to vector<1x8x128xf32>
      %64 = arith.select %59, %56, %63 : vector<1x8x128xi1>, vector<1x8x128xf32>
      %cst_47 = arith.constant dense<0.000000e+00> : vector<8x128xf32>
      %65 = vector.multi_reduction <add>, %64, %cst_47 [0] : vector<1x8x128xf32> to vector<8x128xf32>
      %66 = arith.addf %62, %65 : vector<8x128xf32>
      %c0_48 = arith.constant 0 : index
      %c1_49 = arith.constant 1 : index
      %c0_50 = arith.constant 0 : index
      %c0_51 = arith.constant 0 : index
      %67 = vector.load %arg6[%c0_48, %c1_49, %c0_50, %c0_51] : memref<3x4x8x128xf32, #tpu.memory_space<vmem>>, vector<1x1x8x128xf32>
      %68 = vector.shape_cast %67 : vector<1x1x8x128xf32> to vector<8x128xf32>
      %69 = vector.shape_cast %66 : vector<8x128xf32> to vector<1x1x8x128xf32>
      tpu.vector_store %arg6[%c0_48, %c1_49, %c0_50, %c0_51], %69 {strides = array<i32>} : memref<3x4x8x128xf32, #tpu.memory_space<vmem>>, vector<1x1x8x128xf32>,
      %c1_52 = arith.constant 1 : index
      %c1_53 = arith.constant 1 : index
      %c0_54 = arith.constant 0 : index
      %c0_55 = arith.constant 0 : index
      %70 = vector.load %arg6[%c1_52, %c1_53, %c0_54, %c0_55] : memref<3x4x8x128xf32, #tpu.memory_space<vmem>>, vector<1x1x8x128xf32>
      %71 = vector.shape_cast %70 : vector<1x1x8x128xf32> to vector<8x128xf32>
      %cst_56 = arith.constant dense<0.000000e+00> : vector<8x128xf32>
      %72 = vector.multi_reduction <add>, %60, %cst_56 [0] : vector<1x8x128xf32> to vector<8x128xf32>
      %73 = arith.addf %71, %72 : vector<8x128xf32>
      %c1_57 = arith.constant 1 : index
      %c1_58 = arith.constant 1 : index
      %c0_59 = arith.constant 0 : index
      %c0_60 = arith.constant 0 : index
      %74 = vector.load %arg6[%c1_57, %c1_58, %c0_59, %c0_60] : memref<3x4x8x128xf32, #tpu.memory_space<vmem>>, vector<1x1x8x128xf32>
      %75 = vector.shape_cast %74 : vector<1x1x8x128xf32> to vector<8x128xf32>
      %76 = vector.shape_cast %73 : vector<8x128xf32> to vector<1x1x8x128xf32>
      tpu.vector_store %arg6[%c1_57, %c1_58, %c0_59, %c0_60], %76 {strides = array<i32>} : memref<3x4x8x128xf32, #tpu.memory_space<vmem>>, vector<1x1x8x128xf32>,
      %c2_61 = arith.constant 2 : index
      %c1_62 = arith.constant 1 : index
      %c0_63 = arith.constant 0 : index
      %c0_64 = arith.constant 0 : index
      %77 = vector.load %arg6[%c2_61, %c1_62, %c0_63, %c0_64] : memref<3x4x8x128xf32, #tpu.memory_space<vmem>>, vector<1x1x8x128xf32>
      %78 = vector.shape_cast %77 : vector<1x1x8x128xf32> to vector<8x128xf32>
      %79 = arith.extui %59 : vector<1x8x128xi1> to vector<1x8x128xi32>
      %80 = arith.sitofp %79 : vector<1x8x128xi32> to vector<1x8x128xf32>
      %cst_65 = arith.constant dense<0.000000e+00> : vector<8x128xf32>
      %81 = vector.multi_reduction <add>, %80, %cst_65 [0] : vector<1x8x128xf32> to vector<8x128xf32>
      %82 = arith.addf %78, %81 : vector<8x128xf32>
      %c2_66 = arith.constant 2 : index
      %c1_67 = arith.constant 1 : index
      %c0_68 = arith.constant 0 : index
      %c0_69 = arith.constant 0 : index
      %83 = vector.load %arg6[%c2_66, %c1_67, %c0_68, %c0_69] : memref<3x4x8x128xf32, #tpu.memory_space<vmem>>, vector<1x1x8x128xf32>
      %84 = vector.shape_cast %83 : vector<1x1x8x128xf32> to vector<8x128xf32>
      %85 = vector.shape_cast %82 : vector<8x128xf32> to vector<1x1x8x128xf32>
      tpu.vector_store %arg6[%c2_66, %c1_67, %c0_68, %c0_69], %85 {strides = array<i32>} : memref<3x4x8x128xf32, #tpu.memory_space<vmem>>, vector<1x1x8x128xf32>,
      %86 = vector.extract_strided_slice %4 {offsets = [2, 0, 0], sizes = [1, 8, 128], strides = [1, 1, 1]} : vector<4x8x128xf32> to vector<1x8x128xf32>
      %87 = vector.shape_cast %86 : vector<1x8x128xf32> to vector<8x128xf32>
      %88 = vector.shape_cast %87 : vector<8x128xf32> to vector<1x8x128xf32>
      %c2_i32_70 = arith.constant 2 : i32
      %89 = vector.broadcast %c2_i32_70 : i32 to vector<8x128xi32>
      %90 = arith.cmpi eq, %10, %89 : vector<8x128xi32>
      %91 = vector.shape_cast %90 : vector<8x128xi1> to vector<1x8x128xi1>
      %92 = arith.mulf %88, %88 : vector<1x8x128xf32>
      %c0_71 = arith.constant 0 : index
      %c2_72 = arith.constant 2 : index
      %c0_73 = arith.constant 0 : index
      %c0_74 = arith.constant 0 : index
      %93 = vector.load %arg6[%c0_71, %c2_72, %c0_73, %c0_74] : memref<3x4x8x128xf32, #tpu.memory_space<vmem>>, vector<1x1x8x128xf32>
      %94 = vector.shape_cast %93 : vector<1x1x8x128xf32> to vector<8x128xf32>
      %cst_75 = arith.constant 0.000000e+00 : f32
      %95 = vector.broadcast %cst_75 : f32 to vector<1x8x128xf32>
      %96 = arith.select %91, %88, %95 : vector<1x8x128xi1>, vector<1x8x128xf32>
      %cst_76 = arith.constant dense<0.000000e+00> : vector<8x128xf32>
      %97 = vector.multi_reduction <add>, %96, %cst_76 [0] : vector<1x8x128xf32> to vector<8x128xf32>
      %98 = arith.addf %94, %97 : vector<8x128xf32>
      %c0_77 = arith.constant 0 : index
      %c2_78 = arith.constant 2 : index
      %c0_79 = arith.constant 0 : index
      %c0_80 = arith.constant 0 : index
      %99 = vector.load %arg6[%c0_77, %c2_78, %c0_79, %c0_80] : memref<3x4x8x128xf32, #tpu.memory_space<vmem>>, vector<1x1x8x128xf32>
      %100 = vector.shape_cast %99 : vector<1x1x8x128xf32> to vector<8x128xf32>
      %101 = vector.shape_cast %98 : vector<8x128xf32> to vector<1x1x8x128xf32>
      tpu.vector_store %arg6[%c0_77, %c2_78, %c0_79, %c0_80], %101 {strides = array<i32>} : memref<3x4x8x128xf32, #tpu.memory_space<vmem>>, vector<1x1x8x128xf32>,
      %c1_81 = arith.constant 1 : index
      %c2_82 = arith.constant 2 : index
      %c0_83 = arith.constant 0 : index
      %c0_84 = arith.constant 0 : index
      %102 = vector.load %arg6[%c1_81, %c2_82, %c0_83, %c0_84] : memref<3x4x8x128xf32, #tpu.memory_space<vmem>>, vector<1x1x8x128xf32>
      %103 = vector.shape_cast %102 : vector<1x1x8x128xf32> to vector<8x128xf32>
      %cst_85 = arith.constant dense<0.000000e+00> : vector<8x128xf32>
      %104 = vector.multi_reduction <add>, %92, %cst_85 [0] : vector<1x8x128xf32> to vector<8x128xf32>
      %105 = arith.addf %103, %104 : vector<8x128xf32>
      %c1_86 = arith.constant 1 : index
      %c2_87 = arith.constant 2 : index
      %c0_88 = arith.constant 0 : index
      %c0_89 = arith.constant 0 : index
      %106 = vector.load %arg6[%c1_86, %c2_87, %c0_88, %c0_89] : memref<3x4x8x128xf32, #tpu.memory_space<vmem>>, vector<1x1x8x128xf32>
      %107 = vector.shape_cast %106 : vector<1x1x8x128xf32> to vector<8x128xf32>
      %108 = vector.shape_cast %105 : vector<8x128xf32> to vector<1x1x8x128xf32>
      tpu.vector_store %arg6[%c1_86, %c2_87, %c0_88, %c0_89], %108 {strides = array<i32>} : memref<3x4x8x128xf32, #tpu.memory_space<vmem>>, vector<1x1x8x128xf32>,
      %c2_90 = arith.constant 2 : index
      %c2_91 = arith.constant 2 : index
      %c0_92 = arith.constant 0 : index
      %c0_93 = arith.constant 0 : index
      %109 = vector.load %arg6[%c2_90, %c2_91, %c0_92, %c0_93] : memref<3x4x8x128xf32, #tpu.memory_space<vmem>>, vector<1x1x8x128xf32>
      %110 = vector.shape_cast %109 : vector<1x1x8x128xf32> to vector<8x128xf32>
      %111 = arith.extui %91 : vector<1x8x128xi1> to vector<1x8x128xi32>
      %112 = arith.sitofp %111 : vector<1x8x128xi32> to vector<1x8x128xf32>
      %cst_94 = arith.constant dense<0.000000e+00> : vector<8x128xf32>
      %113 = vector.multi_reduction <add>, %112, %cst_94 [0] : vector<1x8x128xf32> to vector<8x128xf32>
      %114 = arith.addf %110, %113 : vector<8x128xf32>
      %c2_95 = arith.constant 2 : index
      %c2_96 = arith.constant 2 : index
      %c0_97 = arith.constant 0 : index
      %c0_98 = arith.constant 0 : index
      %115 = vector.load %arg6[%c2_95, %c2_96, %c0_97, %c0_98] : memref<3x4x8x128xf32, #tpu.memory_space<vmem>>, vector<1x1x8x128xf32>
      %116 = vector.shape_cast %115 : vector<1x1x8x128xf32> to vector<8x128xf32>
      %117 = vector.shape_cast %114 : vector<8x128xf32> to vector<1x1x8x128xf32>
      tpu.vector_store %arg6[%c2_95, %c2_96, %c0_97, %c0_98], %117 {strides = array<i32>} : memref<3x4x8x128xf32, #tpu.memory_space<vmem>>, vector<1x1x8x128xf32>,
      %118 = vector.extract_strided_slice %4 {offsets = [3, 0, 0], sizes = [1, 8, 128], strides = [1, 1, 1]} : vector<4x8x128xf32> to vector<1x8x128xf32>
      %119 = vector.shape_cast %118 : vector<1x8x128xf32> to vector<8x128xf32>
      %120 = vector.shape_cast %119 : vector<8x128xf32> to vector<1x8x128xf32>
      %c3_i32 = arith.constant 3 : i32
      %121 = vector.broadcast %c3_i32 : i32 to vector<8x128xi32>
      %122 = arith.cmpi eq, %10, %121 : vector<8x128xi32>
      %123 = vector.shape_cast %122 : vector<8x128xi1> to vector<1x8x128xi1>
      %124 = arith.mulf %120, %120 : vector<1x8x128xf32>
      %c0_99 = arith.constant 0 : index
      %c3 = arith.constant 3 : index
      %c0_100 = arith.constant 0 : index
      %c0_101 = arith.constant 0 : index
      %125 = vector.load %arg6[%c0_99, %c3, %c0_100, %c0_101] : memref<3x4x8x128xf32, #tpu.memory_space<vmem>>, vector<1x1x8x128xf32>
      %126 = vector.shape_cast %125 : vector<1x1x8x128xf32> to vector<8x128xf32>
      %cst_102 = arith.constant 0.000000e+00 : f32
      %127 = vector.broadcast %cst_102 : f32 to vector<1x8x128xf32>
      %128 = arith.select %123, %120, %127 : vector<1x8x128xi1>, vector<1x8x128xf32>
      %cst_103 = arith.constant dense<0.000000e+00> : vector<8x128xf32>
      %129 = vector.multi_reduction <add>, %128, %cst_103 [0] : vector<1x8x128xf32> to vector<8x128xf32>
      %130 = arith.addf %126, %129 : vector<8x128xf32>
      %c0_104 = arith.constant 0 : index
      %c3_105 = arith.constant 3 : index
      %c0_106 = arith.constant 0 : index
      %c0_107 = arith.constant 0 : index
      %131 = vector.load %arg6[%c0_104, %c3_105, %c0_106, %c0_107] : memref<3x4x8x128xf32, #tpu.memory_space<vmem>>, vector<1x1x8x128xf32>
      %132 = vector.shape_cast %131 : vector<1x1x8x128xf32> to vector<8x128xf32>
      %133 = vector.shape_cast %130 : vector<8x128xf32> to vector<1x1x8x128xf32>
      tpu.vector_store %arg6[%c0_104, %c3_105, %c0_106, %c0_107], %133 {strides = array<i32>} : memref<3x4x8x128xf32, #tpu.memory_space<vmem>>, vector<1x1x8x128xf32>,
      %c1_108 = arith.constant 1 : index
      %c3_109 = arith.constant 3 : index
      %c0_110 = arith.constant 0 : index
      %c0_111 = arith.constant 0 : index
      %134 = vector.load %arg6[%c1_108, %c3_109, %c0_110, %c0_111] : memref<3x4x8x128xf32, #tpu.memory_space<vmem>>, vector<1x1x8x128xf32>
      %135 = vector.shape_cast %134 : vector<1x1x8x128xf32> to vector<8x128xf32>
      %cst_112 = arith.constant dense<0.000000e+00> : vector<8x128xf32>
      %136 = vector.multi_reduction <add>, %124, %cst_112 [0] : vector<1x8x128xf32> to vector<8x128xf32>
      %137 = arith.addf %135, %136 : vector<8x128xf32>
      %c1_113 = arith.constant 1 : index
      %c3_114 = arith.constant 3 : index
      %c0_115 = arith.constant 0 : index
      %c0_116 = arith.constant 0 : index
      %138 = vector.load %arg6[%c1_113, %c3_114, %c0_115, %c0_116] : memref<3x4x8x128xf32, #tpu.memory_space<vmem>>, vector<1x1x8x128xf32>
      %139 = vector.shape_cast %138 : vector<1x1x8x128xf32> to vector<8x128xf32>
      %140 = vector.shape_cast %137 : vector<8x128xf32> to vector<1x1x8x128xf32>
      tpu.vector_store %arg6[%c1_113, %c3_114, %c0_115, %c0_116], %140 {strides = array<i32>} : memref<3x4x8x128xf32, #tpu.memory_space<vmem>>, vector<1x1x8x128xf32>,
      %c2_117 = arith.constant 2 : index
      %c3_118 = arith.constant 3 : index
      %c0_119 = arith.constant 0 : index
      %c0_120 = arith.constant 0 : index
      %141 = vector.load %arg6[%c2_117, %c3_118, %c0_119, %c0_120] : memref<3x4x8x128xf32, #tpu.memory_space<vmem>>, vector<1x1x8x128xf32>
      %142 = vector.shape_cast %141 : vector<1x1x8x128xf32> to vector<8x128xf32>
      %143 = arith.extui %123 : vector<1x8x128xi1> to vector<1x8x128xi32>
      %144 = arith.sitofp %143 : vector<1x8x128xi32> to vector<1x8x128xf32>
      %cst_121 = arith.constant dense<0.000000e+00> : vector<8x128xf32>
      %145 = vector.multi_reduction <add>, %144, %cst_121 [0] : vector<1x8x128xf32> to vector<8x128xf32>
      %146 = arith.addf %142, %145 : vector<8x128xf32>
      %c2_122 = arith.constant 2 : index
      %c3_123 = arith.constant 3 : index
      %c0_124 = arith.constant 0 : index
      %c0_125 = arith.constant 0 : index
      %147 = vector.load %arg6[%c2_122, %c3_123, %c0_124, %c0_125] : memref<3x4x8x128xf32, #tpu.memory_space<vmem>>, vector<1x1x8x128xf32>
      %148 = vector.shape_cast %147 : vector<1x1x8x128xf32> to vector<8x128xf32>
      %149 = vector.shape_cast %146 : vector<8x128xf32> to vector<1x1x8x128xf32>
      tpu.vector_store %arg6[%c2_122, %c3_123, %c0_124, %c0_125], %149 {strides = array<i32>} : memref<3x4x8x128xf32, #tpu.memory_space<vmem>>, vector<1x1x8x128xf32>,
    } else {
    }
    %c0_i32_11 = arith.constant 0 : i32
    %16 = arith.cmpi sge, %12, %c0_i32_11 : i32
    %17 = arith.extui %16 : i1 to i32
    %c0_i32_12 = arith.constant 0 : i32
    %18 = arith.cmpi ne, %17, %c0_i32_12 : i32
    scf.if %18 {
      %c8_i32 = arith.constant 8 : i32
      %22 = arith.muli %12, %c8_i32 : i32
      %23 = tpu.iota {dimensions = array<i32: 0>} : vector<8x128xi32>
      %24 = vector.broadcast %22 : i32 to vector<8x128xi32>
      %25 = arith.addi %24, %23 : vector<8x128xi32>
      %26 = tpu.iota {dimensions = array<i32: 1>} : vector<8x128xi32>
      %c2_i32_15 = arith.constant 2 : i32
      %27 = vector.broadcast %c2_i32_15 : i32 to vector<8x128xi32>
      %28 = arith.cmpi slt, %25, %27 : vector<8x128xi32>
      %c2_i32_16 = arith.constant 2 : i32
      %29 = vector.broadcast %c2_i32_16 : i32 to vector<8x128xi32>
      %30 = arith.cmpi eq, %25, %29 : vector<8x128xi32>
      %c0_i32_17 = arith.constant 0 : i32
      %31 = vector.broadcast %c0_i32_17 : i32 to vector<8x128xi32>
      %32 = arith.cmpi slt, %26, %31 : vector<8x128xi32>
      %33 = arith.andi %30, %32 : vector<8x128xi1>
      %34 = arith.ori %28, %33 : vector<8x128xi1>
      %c4_i32 = arith.constant 4 : i32
      %35 = vector.broadcast %c4_i32 : i32 to vector<8x128xi32>
      %36 = arith.select %34, %10, %35 : vector<8x128xi1>, vector<8x128xi32>
      %37 = vector.shape_cast %34 : vector<8x128xi1> to vector<1x8x128xi1>
      %38 = vector.extract_strided_slice %4 {offsets = [0, 0, 0], sizes = [1, 8, 128], strides = [1, 1, 1]} : vector<4x8x128xf32> to vector<1x8x128xf32>
      %39 = vector.shape_cast %38 : vector<1x8x128xf32> to vector<8x128xf32>
      %40 = vector.shape_cast %39 : vector<8x128xf32> to vector<1x8x128xf32>
      %c0_i32_18 = arith.constant 0 : i32
      %41 = vector.broadcast %c0_i32_18 : i32 to vector<8x128xi32>
      %42 = arith.cmpi eq, %36, %41 : vector<8x128xi32>
      %43 = vector.shape_cast %42 : vector<8x128xi1> to vector<1x8x128xi1>
      %44 = arith.mulf %40, %40 : vector<1x8x128xf32>
      %cst = arith.constant 0.000000e+00 : f32
      %45 = vector.broadcast %cst : f32 to vector<1x8x128xf32>
      %46 = arith.select %37, %44, %45 : vector<1x8x128xi1>, vector<1x8x128xf32>
      %c0_19 = arith.constant 0 : index
      %c0_20 = arith.constant 0 : index
      %c0_21 = arith.constant 0 : index
      %c0_22 = arith.constant 0 : index
      %47 = vector.load %arg6[%c0_19, %c0_20, %c0_21, %c0_22] : memref<3x4x8x128xf32, #tpu.memory_space<vmem>>, vector<1x1x8x128xf32>
      %48 = vector.shape_cast %47 : vector<1x1x8x128xf32> to vector<8x128xf32>
      %cst_23 = arith.constant 0.000000e+00 : f32
      %49 = vector.broadcast %cst_23 : f32 to vector<1x8x128xf32>
      %50 = arith.select %43, %40, %49 : vector<1x8x128xi1>, vector<1x8x128xf32>
      %cst_24 = arith.constant dense<0.000000e+00> : vector<8x128xf32>
      %51 = vector.multi_reduction <add>, %50, %cst_24 [0] : vector<1x8x128xf32> to vector<8x128xf32>
      %52 = arith.addf %48, %51 : vector<8x128xf32>
      %c0_25 = arith.constant 0 : index
      %c0_26 = arith.constant 0 : index
      %c0_27 = arith.constant 0 : index
      %c0_28 = arith.constant 0 : index
      %53 = vector.load %arg6[%c0_25, %c0_26, %c0_27, %c0_28] : memref<3x4x8x128xf32, #tpu.memory_space<vmem>>, vector<1x1x8x128xf32>
      %54 = vector.shape_cast %53 : vector<1x1x8x128xf32> to vector<8x128xf32>
      %55 = vector.shape_cast %52 : vector<8x128xf32> to vector<1x1x8x128xf32>
      tpu.vector_store %arg6[%c0_25, %c0_26, %c0_27, %c0_28], %55 {strides = array<i32>} : memref<3x4x8x128xf32, #tpu.memory_space<vmem>>, vector<1x1x8x128xf32>,
      %c1 = arith.constant 1 : index
      %c0_29 = arith.constant 0 : index
      %c0_30 = arith.constant 0 : index
      %c0_31 = arith.constant 0 : index
      %56 = vector.load %arg6[%c1, %c0_29, %c0_30, %c0_31] : memref<3x4x8x128xf32, #tpu.memory_space<vmem>>, vector<1x1x8x128xf32>
      %57 = vector.shape_cast %56 : vector<1x1x8x128xf32> to vector<8x128xf32>
      %cst_32 = arith.constant dense<0.000000e+00> : vector<8x128xf32>
      %58 = vector.multi_reduction <add>, %46, %cst_32 [0] : vector<1x8x128xf32> to vector<8x128xf32>
      %59 = arith.addf %57, %58 : vector<8x128xf32>
      %c1_33 = arith.constant 1 : index
      %c0_34 = arith.constant 0 : index
      %c0_35 = arith.constant 0 : index
      %c0_36 = arith.constant 0 : index
      %60 = vector.load %arg6[%c1_33, %c0_34, %c0_35, %c0_36] : memref<3x4x8x128xf32, #tpu.memory_space<vmem>>, vector<1x1x8x128xf32>
      %61 = vector.shape_cast %60 : vector<1x1x8x128xf32> to vector<8x128xf32>
      %62 = vector.shape_cast %59 : vector<8x128xf32> to vector<1x1x8x128xf32>
      tpu.vector_store %arg6[%c1_33, %c0_34, %c0_35, %c0_36], %62 {strides = array<i32>} : memref<3x4x8x128xf32, #tpu.memory_space<vmem>>, vector<1x1x8x128xf32>,
      %c2 = arith.constant 2 : index
      %c0_37 = arith.constant 0 : index
      %c0_38 = arith.constant 0 : index
      %c0_39 = arith.constant 0 : index
      %63 = vector.load %arg6[%c2, %c0_37, %c0_38, %c0_39] : memref<3x4x8x128xf32, #tpu.memory_space<vmem>>, vector<1x1x8x128xf32>
      %64 = vector.shape_cast %63 : vector<1x1x8x128xf32> to vector<8x128xf32>
      %65 = arith.extui %43 : vector<1x8x128xi1> to vector<1x8x128xi32>
      %66 = arith.sitofp %65 : vector<1x8x128xi32> to vector<1x8x128xf32>
      %cst_40 = arith.constant dense<0.000000e+00> : vector<8x128xf32>
      %67 = vector.multi_reduction <add>, %66, %cst_40 [0] : vector<1x8x128xf32> to vector<8x128xf32>
      %68 = arith.addf %64, %67 : vector<8x128xf32>
      %c2_41 = arith.constant 2 : index
      %c0_42 = arith.constant 0 : index
      %c0_43 = arith.constant 0 : index
      %c0_44 = arith.constant 0 : index
      %69 = vector.load %arg6[%c2_41, %c0_42, %c0_43, %c0_44] : memref<3x4x8x128xf32, #tpu.memory_space<vmem>>, vector<1x1x8x128xf32>
      %70 = vector.shape_cast %69 : vector<1x1x8x128xf32> to vector<8x128xf32>
      %71 = vector.shape_cast %68 : vector<8x128xf32> to vector<1x1x8x128xf32>
      tpu.vector_store %arg6[%c2_41, %c0_42, %c0_43, %c0_44], %71 {strides = array<i32>} : memref<3x4x8x128xf32, #tpu.memory_space<vmem>>, vector<1x1x8x128xf32>,
      %72 = vector.extract_strided_slice %4 {offsets = [1, 0, 0], sizes = [1, 8, 128], strides = [1, 1, 1]} : vector<4x8x128xf32> to vector<1x8x128xf32>
      %73 = vector.shape_cast %72 : vector<1x8x128xf32> to vector<8x128xf32>
      %74 = vector.shape_cast %73 : vector<8x128xf32> to vector<1x8x128xf32>
      %c1_i32_45 = arith.constant 1 : i32
      %75 = vector.broadcast %c1_i32_45 : i32 to vector<8x128xi32>
      %76 = arith.cmpi eq, %36, %75 : vector<8x128xi32>
      %77 = vector.shape_cast %76 : vector<8x128xi1> to vector<1x8x128xi1>
      %78 = arith.mulf %74, %74 : vector<1x8x128xf32>
      %cst_46 = arith.constant 0.000000e+00 : f32
      %79 = vector.broadcast %cst_46 : f32 to vector<1x8x128xf32>
      %80 = arith.select %37, %78, %79 : vector<1x8x128xi1>, vector<1x8x128xf32>
      %c0_47 = arith.constant 0 : index
      %c1_48 = arith.constant 1 : index
      %c0_49 = arith.constant 0 : index
      %c0_50 = arith.constant 0 : index
      %81 = vector.load %arg6[%c0_47, %c1_48, %c0_49, %c0_50] : memref<3x4x8x128xf32, #tpu.memory_space<vmem>>, vector<1x1x8x128xf32>
      %82 = vector.shape_cast %81 : vector<1x1x8x128xf32> to vector<8x128xf32>
      %cst_51 = arith.constant 0.000000e+00 : f32
      %83 = vector.broadcast %cst_51 : f32 to vector<1x8x128xf32>
      %84 = arith.select %77, %74, %83 : vector<1x8x128xi1>, vector<1x8x128xf32>
      %cst_52 = arith.constant dense<0.000000e+00> : vector<8x128xf32>
      %85 = vector.multi_reduction <add>, %84, %cst_52 [0] : vector<1x8x128xf32> to vector<8x128xf32>
      %86 = arith.addf %82, %85 : vector<8x128xf32>
      %c0_53 = arith.constant 0 : index
      %c1_54 = arith.constant 1 : index
      %c0_55 = arith.constant 0 : index
      %c0_56 = arith.constant 0 : index
      %87 = vector.load %arg6[%c0_53, %c1_54, %c0_55, %c0_56] : memref<3x4x8x128xf32, #tpu.memory_space<vmem>>, vector<1x1x8x128xf32>
      %88 = vector.shape_cast %87 : vector<1x1x8x128xf32> to vector<8x128xf32>
      %89 = vector.shape_cast %86 : vector<8x128xf32> to vector<1x1x8x128xf32>
      tpu.vector_store %arg6[%c0_53, %c1_54, %c0_55, %c0_56], %89 {strides = array<i32>} : memref<3x4x8x128xf32, #tpu.memory_space<vmem>>, vector<1x1x8x128xf32>,
      %c1_57 = arith.constant 1 : index
      %c1_58 = arith.constant 1 : index
      %c0_59 = arith.constant 0 : index
      %c0_60 = arith.constant 0 : index
      %90 = vector.load %arg6[%c1_57, %c1_58, %c0_59, %c0_60] : memref<3x4x8x128xf32, #tpu.memory_space<vmem>>, vector<1x1x8x128xf32>
      %91 = vector.shape_cast %90 : vector<1x1x8x128xf32> to vector<8x128xf32>
      %cst_61 = arith.constant dense<0.000000e+00> : vector<8x128xf32>
      %92 = vector.multi_reduction <add>, %80, %cst_61 [0] : vector<1x8x128xf32> to vector<8x128xf32>
      %93 = arith.addf %91, %92 : vector<8x128xf32>
      %c1_62 = arith.constant 1 : index
      %c1_63 = arith.constant 1 : index
      %c0_64 = arith.constant 0 : index
      %c0_65 = arith.constant 0 : index
      %94 = vector.load %arg6[%c1_62, %c1_63, %c0_64, %c0_65] : memref<3x4x8x128xf32, #tpu.memory_space<vmem>>, vector<1x1x8x128xf32>
      %95 = vector.shape_cast %94 : vector<1x1x8x128xf32> to vector<8x128xf32>
      %96 = vector.shape_cast %93 : vector<8x128xf32> to vector<1x1x8x128xf32>
      tpu.vector_store %arg6[%c1_62, %c1_63, %c0_64, %c0_65], %96 {strides = array<i32>} : memref<3x4x8x128xf32, #tpu.memory_space<vmem>>, vector<1x1x8x128xf32>,
      %c2_66 = arith.constant 2 : index
      %c1_67 = arith.constant 1 : index
      %c0_68 = arith.constant 0 : index
      %c0_69 = arith.constant 0 : index
      %97 = vector.load %arg6[%c2_66, %c1_67, %c0_68, %c0_69] : memref<3x4x8x128xf32, #tpu.memory_space<vmem>>, vector<1x1x8x128xf32>
      %98 = vector.shape_cast %97 : vector<1x1x8x128xf32> to vector<8x128xf32>
      %99 = arith.extui %77 : vector<1x8x128xi1> to vector<1x8x128xi32>
      %100 = arith.sitofp %99 : vector<1x8x128xi32> to vector<1x8x128xf32>
      %cst_70 = arith.constant dense<0.000000e+00> : vector<8x128xf32>
      %101 = vector.multi_reduction <add>, %100, %cst_70 [0] : vector<1x8x128xf32> to vector<8x128xf32>
      %102 = arith.addf %98, %101 : vector<8x128xf32>
      %c2_71 = arith.constant 2 : index
      %c1_72 = arith.constant 1 : index
      %c0_73 = arith.constant 0 : index
      %c0_74 = arith.constant 0 : index
      %103 = vector.load %arg6[%c2_71, %c1_72, %c0_73, %c0_74] : memref<3x4x8x128xf32, #tpu.memory_space<vmem>>, vector<1x1x8x128xf32>
      %104 = vector.shape_cast %103 : vector<1x1x8x128xf32> to vector<8x128xf32>
      %105 = vector.shape_cast %102 : vector<8x128xf32> to vector<1x1x8x128xf32>
      tpu.vector_store %arg6[%c2_71, %c1_72, %c0_73, %c0_74], %105 {strides = array<i32>} : memref<3x4x8x128xf32, #tpu.memory_space<vmem>>, vector<1x1x8x128xf32>,
      %106 = vector.extract_strided_slice %4 {offsets = [2, 0, 0], sizes = [1, 8, 128], strides = [1, 1, 1]} : vector<4x8x128xf32> to vector<1x8x128xf32>
      %107 = vector.shape_cast %106 : vector<1x8x128xf32> to vector<8x128xf32>
      %108 = vector.shape_cast %107 : vector<8x128xf32> to vector<1x8x128xf32>
      %c2_i32_75 = arith.constant 2 : i32
      %109 = vector.broadcast %c2_i32_75 : i32 to vector<8x128xi32>
      %110 = arith.cmpi eq, %36, %109 : vector<8x128xi32>
      %111 = vector.shape_cast %110 : vector<8x128xi1> to vector<1x8x128xi1>
      %112 = arith.mulf %108, %108 : vector<1x8x128xf32>
      %cst_76 = arith.constant 0.000000e+00 : f32
      %113 = vector.broadcast %cst_76 : f32 to vector<1x8x128xf32>
      %114 = arith.select %37, %112, %113 : vector<1x8x128xi1>, vector<1x8x128xf32>
      %c0_77 = arith.constant 0 : index
      %c2_78 = arith.constant 2 : index
      %c0_79 = arith.constant 0 : index
      %c0_80 = arith.constant 0 : index
      %115 = vector.load %arg6[%c0_77, %c2_78, %c0_79, %c0_80] : memref<3x4x8x128xf32, #tpu.memory_space<vmem>>, vector<1x1x8x128xf32>
      %116 = vector.shape_cast %115 : vector<1x1x8x128xf32> to vector<8x128xf32>
      %cst_81 = arith.constant 0.000000e+00 : f32
      %117 = vector.broadcast %cst_81 : f32 to vector<1x8x128xf32>
      %118 = arith.select %111, %108, %117 : vector<1x8x128xi1>, vector<1x8x128xf32>
      %cst_82 = arith.constant dense<0.000000e+00> : vector<8x128xf32>
      %119 = vector.multi_reduction <add>, %118, %cst_82 [0] : vector<1x8x128xf32> to vector<8x128xf32>
      %120 = arith.addf %116, %119 : vector<8x128xf32>
      %c0_83 = arith.constant 0 : index
      %c2_84 = arith.constant 2 : index
      %c0_85 = arith.constant 0 : index
      %c0_86 = arith.constant 0 : index
      %121 = vector.load %arg6[%c0_83, %c2_84, %c0_85, %c0_86] : memref<3x4x8x128xf32, #tpu.memory_space<vmem>>, vector<1x1x8x128xf32>
      %122 = vector.shape_cast %121 : vector<1x1x8x128xf32> to vector<8x128xf32>
      %123 = vector.shape_cast %120 : vector<8x128xf32> to vector<1x1x8x128xf32>
      tpu.vector_store %arg6[%c0_83, %c2_84, %c0_85, %c0_86], %123 {strides = array<i32>} : memref<3x4x8x128xf32, #tpu.memory_space<vmem>>, vector<1x1x8x128xf32>,
      %c1_87 = arith.constant 1 : index
      %c2_88 = arith.constant 2 : index
      %c0_89 = arith.constant 0 : index
      %c0_90 = arith.constant 0 : index
      %124 = vector.load %arg6[%c1_87, %c2_88, %c0_89, %c0_90] : memref<3x4x8x128xf32, #tpu.memory_space<vmem>>, vector<1x1x8x128xf32>
      %125 = vector.shape_cast %124 : vector<1x1x8x128xf32> to vector<8x128xf32>
      %cst_91 = arith.constant dense<0.000000e+00> : vector<8x128xf32>
      %126 = vector.multi_reduction <add>, %114, %cst_91 [0] : vector<1x8x128xf32> to vector<8x128xf32>
      %127 = arith.addf %125, %126 : vector<8x128xf32>
      %c1_92 = arith.constant 1 : index
      %c2_93 = arith.constant 2 : index
      %c0_94 = arith.constant 0 : index
      %c0_95 = arith.constant 0 : index
      %128 = vector.load %arg6[%c1_92, %c2_93, %c0_94, %c0_95] : memref<3x4x8x128xf32, #tpu.memory_space<vmem>>, vector<1x1x8x128xf32>
      %129 = vector.shape_cast %128 : vector<1x1x8x128xf32> to vector<8x128xf32>
      %130 = vector.shape_cast %127 : vector<8x128xf32> to vector<1x1x8x128xf32>
      tpu.vector_store %arg6[%c1_92, %c2_93, %c0_94, %c0_95], %130 {strides = array<i32>} : memref<3x4x8x128xf32, #tpu.memory_space<vmem>>, vector<1x1x8x128xf32>,
      %c2_96 = arith.constant 2 : index
      %c2_97 = arith.constant 2 : index
      %c0_98 = arith.constant 0 : index
      %c0_99 = arith.constant 0 : index
      %131 = vector.load %arg6[%c2_96, %c2_97, %c0_98, %c0_99] : memref<3x4x8x128xf32, #tpu.memory_space<vmem>>, vector<1x1x8x128xf32>
      %132 = vector.shape_cast %131 : vector<1x1x8x128xf32> to vector<8x128xf32>
      %133 = arith.extui %111 : vector<1x8x128xi1> to vector<1x8x128xi32>
      %134 = arith.sitofp %133 : vector<1x8x128xi32> to vector<1x8x128xf32>
      %cst_100 = arith.constant dense<0.000000e+00> : vector<8x128xf32>
      %135 = vector.multi_reduction <add>, %134, %cst_100 [0] : vector<1x8x128xf32> to vector<8x128xf32>
      %136 = arith.addf %132, %135 : vector<8x128xf32>
      %c2_101 = arith.constant 2 : index
      %c2_102 = arith.constant 2 : index
      %c0_103 = arith.constant 0 : index
      %c0_104 = arith.constant 0 : index
      %137 = vector.load %arg6[%c2_101, %c2_102, %c0_103, %c0_104] : memref<3x4x8x128xf32, #tpu.memory_space<vmem>>, vector<1x1x8x128xf32>
      %138 = vector.shape_cast %137 : vector<1x1x8x128xf32> to vector<8x128xf32>
      %139 = vector.shape_cast %136 : vector<8x128xf32> to vector<1x1x8x128xf32>
      tpu.vector_store %arg6[%c2_101, %c2_102, %c0_103, %c0_104], %139 {strides = array<i32>} : memref<3x4x8x128xf32, #tpu.memory_space<vmem>>, vector<1x1x8x128xf32>,
      %140 = vector.extract_strided_slice %4 {offsets = [3, 0, 0], sizes = [1, 8, 128], strides = [1, 1, 1]} : vector<4x8x128xf32> to vector<1x8x128xf32>
      %141 = vector.shape_cast %140 : vector<1x8x128xf32> to vector<8x128xf32>
      %142 = vector.shape_cast %141 : vector<8x128xf32> to vector<1x8x128xf32>
      %c3_i32 = arith.constant 3 : i32
      %143 = vector.broadcast %c3_i32 : i32 to vector<8x128xi32>
      %144 = arith.cmpi eq, %36, %143 : vector<8x128xi32>
      %145 = vector.shape_cast %144 : vector<8x128xi1> to vector<1x8x128xi1>
      %146 = arith.mulf %142, %142 : vector<1x8x128xf32>
      %cst_105 = arith.constant 0.000000e+00 : f32
      %147 = vector.broadcast %cst_105 : f32 to vector<1x8x128xf32>
      %148 = arith.select %37, %146, %147 : vector<1x8x128xi1>, vector<1x8x128xf32>
      %c0_106 = arith.constant 0 : index
      %c3 = arith.constant 3 : index
      %c0_107 = arith.constant 0 : index
      %c0_108 = arith.constant 0 : index
      %149 = vector.load %arg6[%c0_106, %c3, %c0_107, %c0_108] : memref<3x4x8x128xf32, #tpu.memory_space<vmem>>, vector<1x1x8x128xf32>
      %150 = vector.shape_cast %149 : vector<1x1x8x128xf32> to vector<8x128xf32>
      %cst_109 = arith.constant 0.000000e+00 : f32
      %151 = vector.broadcast %cst_109 : f32 to vector<1x8x128xf32>
      %152 = arith.select %145, %142, %151 : vector<1x8x128xi1>, vector<1x8x128xf32>
      %cst_110 = arith.constant dense<0.000000e+00> : vector<8x128xf32>
      %153 = vector.multi_reduction <add>, %152, %cst_110 [0] : vector<1x8x128xf32> to vector<8x128xf32>
      %154 = arith.addf %150, %153 : vector<8x128xf32>
      %c0_111 = arith.constant 0 : index
      %c3_112 = arith.constant 3 : index
      %c0_113 = arith.constant 0 : index
      %c0_114 = arith.constant 0 : index
      %155 = vector.load %arg6[%c0_111, %c3_112, %c0_113, %c0_114] : memref<3x4x8x128xf32, #tpu.memory_space<vmem>>, vector<1x1x8x128xf32>
      %156 = vector.shape_cast %155 : vector<1x1x8x128xf32> to vector<8x128xf32>
      %157 = vector.shape_cast %154 : vector<8x128xf32> to vector<1x1x8x128xf32>
      tpu.vector_store %arg6[%c0_111, %c3_112, %c0_113, %c0_114], %157 {strides = array<i32>} : memref<3x4x8x128xf32, #tpu.memory_space<vmem>>, vector<1x1x8x128xf32>,
      %c1_115 = arith.constant 1 : index
      %c3_116 = arith.constant 3 : index
      %c0_117 = arith.constant 0 : index
      %c0_118 = arith.constant 0 : index
      %158 = vector.load %arg6[%c1_115, %c3_116, %c0_117, %c0_118] : memref<3x4x8x128xf32, #tpu.memory_space<vmem>>, vector<1x1x8x128xf32>
      %159 = vector.shape_cast %158 : vector<1x1x8x128xf32> to vector<8x128xf32>
      %cst_119 = arith.constant dense<0.000000e+00> : vector<8x128xf32>
      %160 = vector.multi_reduction <add>, %148, %cst_119 [0] : vector<1x8x128xf32> to vector<8x128xf32>
      %161 = arith.addf %159, %160 : vector<8x128xf32>
      %c1_120 = arith.constant 1 : index
      %c3_121 = arith.constant 3 : index
      %c0_122 = arith.constant 0 : index
      %c0_123 = arith.constant 0 : index
      %162 = vector.load %arg6[%c1_120, %c3_121, %c0_122, %c0_123] : memref<3x4x8x128xf32, #tpu.memory_space<vmem>>, vector<1x1x8x128xf32>
      %163 = vector.shape_cast %162 : vector<1x1x8x128xf32> to vector<8x128xf32>
      %164 = vector.shape_cast %161 : vector<8x128xf32> to vector<1x1x8x128xf32>
      tpu.vector_store %arg6[%c1_120, %c3_121, %c0_122, %c0_123], %164 {strides = array<i32>} : memref<3x4x8x128xf32, #tpu.memory_space<vmem>>, vector<1x1x8x128xf32>,
      %c2_124 = arith.constant 2 : index
      %c3_125 = arith.constant 3 : index
      %c0_126 = arith.constant 0 : index
      %c0_127 = arith.constant 0 : index
      %165 = vector.load %arg6[%c2_124, %c3_125, %c0_126, %c0_127] : memref<3x4x8x128xf32, #tpu.memory_space<vmem>>, vector<1x1x8x128xf32>
      %166 = vector.shape_cast %165 : vector<1x1x8x128xf32> to vector<8x128xf32>
      %167 = arith.extui %145 : vector<1x8x128xi1> to vector<1x8x128xi32>
      %168 = arith.sitofp %167 : vector<1x8x128xi32> to vector<1x8x128xf32>
      %cst_128 = arith.constant dense<0.000000e+00> : vector<8x128xf32>
      %169 = vector.multi_reduction <add>, %168, %cst_128 [0] : vector<1x8x128xf32> to vector<8x128xf32>
      %170 = arith.addf %166, %169 : vector<8x128xf32>
      %c2_129 = arith.constant 2 : index
      %c3_130 = arith.constant 3 : index
      %c0_131 = arith.constant 0 : index
      %c0_132 = arith.constant 0 : index
      %171 = vector.load %arg6[%c2_129, %c3_130, %c0_131, %c0_132] : memref<3x4x8x128xf32, #tpu.memory_space<vmem>>, vector<1x1x8x128xf32>
      %172 = vector.shape_cast %171 : vector<1x1x8x128xf32> to vector<8x128xf32>
      %173 = vector.shape_cast %170 : vector<8x128xf32> to vector<1x1x8x128xf32>
      tpu.vector_store %arg6[%c2_129, %c3_130, %c0_131, %c0_132], %173 {strides = array<i32>} : memref<3x4x8x128xf32, #tpu.memory_space<vmem>>, vector<1x1x8x128xf32>,
    } else {
    }
    %c0_i32_13 = arith.constant 0 : i32
    %19 = arith.cmpi eq, %arg2, %c0_i32_13 : i32
    %20 = arith.extui %19 : i1 to i32
    %c0_i32_14 = arith.constant 0 : i32
    %21 = arith.cmpi ne, %20, %c0_i32_14 : i32
    scf.if %21 {
      %c0_15 = arith.constant 0 : index
      %c0_16 = arith.constant 0 : index
      %c0_17 = arith.constant 0 : index
      %c0_18 = arith.constant 0 : index
      %22 = vector.load %arg6[%c0_15, %c0_16, %c0_17, %c0_18] : memref<3x4x8x128xf32, #tpu.memory_space<vmem>>, vector<3x4x8x128xf32>
      %cst = arith.constant dense<0.000000e+00> : vector<3x4x128xf32>
      %23 = vector.multi_reduction <add>, %22, %cst [2] : vector<3x4x8x128xf32> to vector<3x4x128xf32>
      %cst_19 = arith.constant dense<0.000000e+00> : vector<3x4xf32>
      %24 = vector.multi_reduction <add>, %23, %cst_19 [2] : vector<3x4x128xf32> to vector<3x4xf32>
      %c0_20 = arith.constant 0 : index
      %c0_21 = arith.constant 0 : index
      %c0_22 = arith.constant 0 : index
      %c0_23 = arith.constant 0 : index
      %25 = vector.load %arg5[%c0_20, %c0_21, %c0_22, %c0_23] : memref<1x1x3x4xf32, #tpu.memory_space<vmem>>, vector<1x1x3x4xf32>
      %26 = vector.shape_cast %25 : vector<1x1x3x4xf32> to vector<3x4xf32>
      %27 = vector.shape_cast %24 : vector<3x4xf32> to vector<1x1x3x4xf32>
      tpu.vector_store %arg5[%c0_20, %c0_21, %c0_22, %c0_23], %27 {strides = array<i32>} : memref<1x1x3x4xf32, #tpu.memory_space<vmem>>, vector<1x1x3x4xf32>,
    } else {
    }
    return
  }
  func.func @transform_0(%arg0: i32, %arg1: i32, %arg2: i32) -> (i32, i32, i32, i32) {
    %c1_i32 = arith.constant 1 : i32
    %0 = arith.muli %arg1, %c1_i32 : i32
    %1 = arith.addi %0, %arg2 : i32
    %c0_i32 = arith.constant 0 : i32
    %c0_i32_0 = arith.constant 0 : i32
    %c0_i32_1 = arith.constant 0 : i32
    return %arg0, %c0_i32, %1, %c0_i32_0 : i32, i32, i32, i32
  }
  func.func @transform_1(%arg0: i32, %arg1: i32, %arg2: i32) -> (i32, i32, i32, i32) {
    %c1_i32 = arith.constant 1 : i32
    %0 = arith.muli %arg1, %c1_i32 : i32
    %1 = arith.addi %0, %arg2 : i32
    %c0_i32 = arith.constant 0 : i32
    %c0_i32_0 = arith.constant 0 : i32
    %c0_i32_1 = arith.constant 0 : i32
    return %arg0, %c0_i32, %1, %c0_i32_0 : i32, i32, i32, i32
  }
  func.func @transform_2(%arg0: i32, %arg1: i32, %arg2: i32) -> (i32, i32, i32, i32) {
    %c0_i32 = arith.constant 0 : i32
    %c0_i32_0 = arith.constant 0 : i32
    %c0_i32_1 = arith.constant 0 : i32
    return %arg0, %arg1, %c0_i32, %c0_i32_0 : i32, i32, i32, i32
  }
}

</mosaic_0001>

<bundles_post_ra>
// kernel: normal_bdice_loss.1
= control target key start
LH: loop header
LB: loop body
LE: loop exit
PB: predicated region body
PF: predicated region fallthrough
CT: control target
= control target key end

     0   :  { %s757_s9 = smov 0   ;;  %s759_s10 = smov 0   ;;  %s839_s0 = inlined_call_operand.vmem [shape: f32[2,4,8,128], index: 0, kind: input, shape index: {}]   ;;  %s840_s1 = inlined_call_operand.vmem [shape: s32[2,1,8,128], index: 1, kind: input, shape index: {}]   ;;  %s841_s2 = inlined_call_operand.vmem [shape: f32[2,1,3,4], index: 2, kind: output, shape index: {}]  }
   0x1   :  { %s761_s11 = smov 0  }
   0x2 LB: > { %s31_s12 = sadd.s32 1, %s735_s10  ;;  %p676_p0 = scmp.ge.s32.totalorder %s739_s11, 1  ;;  %s739_s11 = sphi %s761_s11, %s12_s11   ;;  %s735_s10 = sphi %s759_s10, %s843_s10   ;;  %s731_s9 = sphi %s757_s9, %s842_s9  }
   0x3   : > { %p33_p1 = scmp.ge.s32.totalorder %s31_s12, 2  ;;  %p160_p2 = scmp.lt.s32.totalorder %s739_s11, 3 }
   0x5   : > { %s845_s12 = smov (%p33_p1, %s31_s12), 0  ;;  %p161_p3 = pnand %p676_p0, %p160_p2 }
   0x6   : > { %p197_p4 = scmp.lt.s32.totalorder (!%p161_p3), %s731_s9, 1 }
   0x7   : > { %164 = sbr.rel (%p161_p3) target bundleno = 194 (0xc2), region = 28 }
   0xc   : > { %v336_v0 = vlaneseq  ;;  %s847_s9 = smov (!%p197_p4, %s731_s9), 1  ;;  %vm530_vm7 = vcmask 1041409   ;;  %vm532_vm8 = vcmask 1042434   ;;  %vm534_vm9 = vcmask 1043459  }
   0xd   : > { %s691_s13 = sshll.u32 %s847_s9, 5  ;;  %s679_s14 = sshll.u32 %s847_s9, 3  ;;  %vm545_vm10 = vcmask 1043456   ;;  %vm575_vm11 = vcmask 26624  }
   0xe   : > { %v337_v1 = vshrl.u32 %v336_v0, 7  ;;  %v559_v2 = vand.u32 127, %v336_v0  ;;  %s204_s17 = scalar_lea.vmem %s839_s0, %s691_s13  ;;  %s213_s20 = scalar_lea.vmem %s840_s1, %s679_s14 }
   0xf   : > { %v238_v4 = vld [vmem:[%s204_s17] sm:$0xff]  ;;  %v239_v5 = vld [vmem:[%s204_s17 + $0x8] sm:$0xff]  ;;  %v240_v6 = vld [vmem:[%s204_s17 + $0x10] sm:$0xff]  ;;  %s680_s21 = sshll.u32 %s847_s9, 2 }
  0x10   : > { %v779_v3 = vsub.s32 %v559_v2, %v337_v1  ;;  %v241_v7 = vld [vmem:[%s204_s17 + $0x18] sm:$0xff]  ;;  %v242_v8 = vld [vmem:[%s213_s20] sm:$0xff]  ;;  %v369_v9 = vmul.f32 %v239_v5, %v239_v5  ;;  %v390_v10 = vmul.f32 %v240_v6, %v240_v6  ;;  %v349_v11 = vmul.f32 %v238_v4, %v238_v4  ;;  %s221_s24 = scalar_lea.vmem %s841_s2, %s680_s21 }
  0x11   : > { %vm243_vm0 = vcmp.gt.s32.totalorder %v242_v8, 0  ;;  %vm342_vm1 = vcmp.lt.s32.totalorder %v337_v1, 2  ;;  %v411_v12 = vmul.f32 %v241_v7, %v241_v7 }
  0x12   : > { %v244_v13 = vsel %vm243_vm0, %v242_v8, 0  ;;  %v350_v14 = vsel %vm342_vm1, %v349_v11, 0.0  ;;  %v370_v15 = vsel %vm342_vm1, %v369_v9, 0.0  ;;  %v391_v16 = vsel %vm342_vm1, %v390_v10, 0.0 }
  0x13   : > { %vm245_vm2 = vcmp.lt.s32.totalorder %v244_v13, 2  ;;  %v412_v17 = vsel %vm342_vm1, %v411_v12, 0.0  ;;  %v470_v18 = vrot.slane %v350_v14, 4  ;;  %v476_v19 = vrot.slane %v370_v15, 4 }
  0x14   : > { %v246_v20 = vsel %vm245_vm2, %v244_v13, 2  ;;  %v482_v21 = vrot.slane %v391_v16, 4  ;;  %v488_v25 = vrot.slane %v412_v17, 4 }
  0x15   : > { %v787_v22 = vsel %vm342_vm1, %v246_v20, 4  ;;  %v471_v23 = vadd.f32 %v470_v18, %v350_v14  ;;  %v477_v24 = vadd.f32 %v476_v19, %v370_v15 }
  0x16   : > { %vm348_vm3 = vcmp.eq.s32.totalorder %v787_v22, 0  ;;  %vm368_vm4 = vcmp.eq.s32.totalorder %v787_v22, 1  ;;  %vm389_vm5 = vcmp.eq.s32.totalorder %v787_v22, 2  ;;  %vm410_vm6 = vcmp.eq.s32.totalorder %v787_v22, 3 }
  0x17   : > { %v352_v26 = vsel %vm348_vm3, %v238_v4, 0.0  ;;  %v373_v27 = vsel %vm368_vm4, %v239_v5, 0.0  ;;  %v394_v28 = vsel %vm389_vm5, %v240_v6, 0.0  ;;  %v415_v29 = vsel %vm410_vm6, %v241_v7, 0.0 }
  0x18   : > { %v446_v30 = vrot.slane %v352_v26, 4  ;;  %v452_v31 = vrot.slane %v373_v27, 4  ;;  %v458_v32 = vrot.slane %v394_v28, 4  ;;  %v464_v33 = vrot.slane %v415_v29, 4 }
  0x19   : > { %v472_v34 = vrot.slane %v471_v23, 2  ;;  %v478_v35 = vrot.slane %v477_v24, 2  ;;  %v483_v36 = vadd.f32 %v482_v21, %v391_v16  ;;  %v489_v37 = vadd.f32 %v488_v25, %v412_v17 }
  0x1a   : > { %v447_v38 = vadd.f32 %v446_v30, %v352_v26  ;;  %v453_v39 = vadd.f32 %v452_v31, %v373_v27  ;;  %v459_v40 = vadd.f32 %v458_v32, %v394_v28  ;;  %v465_v41 = vadd.f32 %v464_v33, %v415_v29 }
  0x1b   : > { %v473_v42 = vadd.f32 %v472_v34, %v471_v23  ;;  %v479_v43 = vadd.f32 %v478_v35, %v477_v24  ;;  %v484_v44 = vrot.slane %v483_v36, 2  ;;  %v490_v45 = vrot.slane %v489_v37, 2 }
  0x1c   : > { %v448_v46 = vrot.slane %v447_v38, 2  ;;  %v454_v47 = vrot.slane %v453_v39, 2  ;;  %v460_v48 = vrot.slane %v459_v40, 2  ;;  %v466_v49 = vrot.slane %v465_v41, 2 }
  0x1d   : > { %v474_v50 = vrot.slane %v473_v42, 1  ;;  %v480_v51 = vrot.slane %v479_v43, 1  ;;  %v485_v52 = vadd.f32 %v484_v44, %v483_v36  ;;  %v491_v53 = vadd.f32 %v490_v45, %v489_v37 }
  0x1e   : > { %v449_v54 = vadd.f32 %v448_v46, %v447_v38  ;;  %v455_v55 = vadd.f32 %v454_v47, %v453_v39  ;;  %v461_v56 = vadd.f32 %v460_v48, %v459_v40  ;;  %v467_v57 = vadd.f32 %v466_v49, %v465_v41 }
  0x1f   : > { %v475_v58 = vadd.f32 %v474_v50, %v473_v42  ;;  %v481_v59 = vadd.f32 %v480_v51, %v479_v43  ;;  %v486_v60 = vrot.slane %v485_v52, 1  ;;  %v492_v61 = vrot.slane %v491_v53, 1 }
  0x20   : > { %v450_v62 = vrot.slane %v449_v54, 1  ;;  %v456_v63 = vrot.slane %v455_v55, 1  ;;  %v462_v0 = vrot.slane %v461_v56, 1  ;;  %v468_v1 = vrot.slane %v467_v57, 1 }
  0x21   : > { %v487_v2 = vadd.f32 %v486_v60, %v485_v52  ;;  %v493_v4 = vadd.f32 %v492_v61, %v491_v53  ;;  %v536_v5 = vsel %vm530_vm7, %v481_v59, %v475_v58  ;;  %v741_v6 = vmov 0.0  }
  0x22   : > { %v685_v7 = vsel %vm348_vm3, 1.0, %v741_v6  ;;  %v451_v8 = vadd.f32 %v450_v62, %v449_v54  ;;  %v457_v9 = vadd.f32 %v456_v63, %v455_v55  ;;  %v463_v10 = vadd.f32 %v462_v0, %v461_v56 }
  0x23   : > { %v469_v11 = vadd.f32 %v468_v1, %v467_v57  ;;  %v537_v12 = vsel %vm532_vm8, %v487_v2, %v536_v5  ;;  %v686_v13 = vsel %vm368_vm4, 1.0, %v741_v6  ;;  %v687_v14 = vsel %vm389_vm5, 1.0, %v741_v6 }
  0x24   : > { %v688_v15 = vsel %vm410_vm6, 1.0, %v741_v6  ;;  %v531_v16 = vsel %vm530_vm7, %v457_v9, %v451_v8  ;;  %v494_v17 = vrot.slane %v685_v7, 4  ;;  %v500_v18 = vrot.slane %v686_v13, 4 }
  0x25   : > { %v533_v19 = vsel %vm532_vm8, %v463_v10, %v531_v16  ;;  %v506_v20 = vrot.slane %v687_v14, 4  ;;  %v512_v21 = vrot.slane %v688_v15, 4  ;;  %v538_v24 = vsel %vm534_vm9, %v493_v4, %v537_v12 }
  0x26   : > { %v535_v23 = vsel %vm534_vm9, %v469_v11, %v533_v19  ;;  %v495_v25 = vadd.f32 %v685_v7, %v494_v17  ;;  %v501_v26 = vadd.f32 %v686_v13, %v500_v18  ;;  %v549_v31 = vsel %vm545_vm10, %v538_v24, 0.0 }
  0x27   : > { %v546_v27 = vsel %vm545_vm10, %v535_v23, 0.0  ;;  %v507_v28 = vadd.f32 %v687_v14, %v506_v20  ;;  %v513_v22 = vadd.f32 %v688_v15, %v512_v21 }
  0x28   : > { %547 = vadd.xlane.f32.xlu0 %v546_v27  ;;  %v496_v29 = vrot.slane %v495_v25, 2  ;;  %v502_v30 = vrot.slane %v501_v26, 2 }
  0x29   : > { %v508_v32 = vrot.slane %v507_v28, 2  ;;  %v514_v33 = vrot.slane %v513_v22, 2 }
  0x2a   : > { %v497_v34 = vadd.f32 %v496_v29, %v495_v25  ;;  %v503_v35 = vadd.f32 %v502_v30, %v501_v26 }
  0x2b   : > { %v509_v36 = vadd.f32 %v508_v32, %v507_v28  ;;  %v515_v37 = vadd.f32 %v514_v33, %v513_v22 }
  0x2c   : > { %550 = vadd.xlane.f32.xlu0 %v549_v31  ;;  %v498_v38 = vrot.slane %v497_v34, 1  ;;  %v504_v39 = vrot.slane %v503_v35, 1 }
  0x2d   : > { %v510_v40 = vrot.slane %v509_v36, 1  ;;  %v516_v41 = vrot.slane %v515_v37, 1 }
  0x2e   : > { %v499_v42 = vadd.f32 %v498_v38, %v497_v34  ;;  %v505_v43 = vadd.f32 %v504_v39, %v503_v35 }
  0x2f   : > { %v511_v44 = vadd.f32 %v510_v40, %v509_v36  ;;  %v517_v45 = vadd.f32 %v516_v41, %v515_v37 }
  0x30   : > { %v539_v46 = vsel %vm530_vm7, %v505_v43, %v499_v42 }
  0x31   : > { %v540_v47 = vsel %vm532_vm8, %v511_v44, %v539_v46 }
  0x32   : > { %v541_v48 = vsel %vm534_vm9, %v517_v45, %v540_v47 }
  0x33   : > { %v552_v49 = vsel %vm545_vm10, %v541_v48, 0.0 }
  0x34   : > { %553 = vadd.xlane.f32.xlu1 %v552_v49 }
  0xb1   : > { %v548_v50 = vpop.xlane.xlu0 %547 }
  0xb2   : > { %v563_v53 = vrot.slane %v548_v50, %v779_v3 }
  0xb5   : > { %v551_v51 = vpop.xlane.xlu0 %550 }
  0xb6   : > { %v567_v52 = vrot.slane %v551_v51, %v779_v3 }
  0xb8   : > { %v572_v54 = vsel %vm530_vm7, %v567_v52, %v563_v53 }
  0xbd   : > { %v554_v55 = vpop.xlane.xlu1 %553 }
  0xbe   : > { %v571_v56 = vrot.slane %v554_v55, %v779_v3 }
  0xc0   : > { %v573_v57 = vsel %vm532_vm8, %v571_v56, %v572_v54 }
  0xc1   : > { %576 = vst.msk [vmem:[%s221_s24] sm:$0x7] %vm575_vm11, %v573_v57 }
  0xc2 PF: > { %s12_s11 = sadd.s32 1, %s739_s11   ;;  %s842_s9 = smov %s735_s10 }
  0xc3   : > { %p9_p5 = scmp.ge.s32.totalorder %s12_s11, 4   ;;  %s843_s10 = smov %s845_s12 }
  0xc5   :  { %11 = sbr.rel (!%p9_p5) target bundleno = 2 (0x2), region = 99 }

</bundles_post_ra>
